<compile_context>
chip_gen: v6e
topology: v6e:2x2x1
jax: 0.10.0
libtpu: 0.0.40
codegen_flags: <defaults>
</compile_context>

<pallas_src>
import functools

import jax
import jax.numpy as jnp
from jax.experimental import pallas as pl
from jax.experimental.pallas import tpu as pltpu

D_HIDDEN = 768          # xlm-roberta-base hidden size (hardcoded in the module)
POS_DIM = 4             # stanzaTokenPosDim
N_UPOS = 17             # uposEmbedding vocabulary
LABEL_NUM = 5           # len('BIEOS')
SLAB = 128              # lane-dense output width (logp in 0:5, appended in 5:9, rest zero)

_HI = jax.lax.Precision.HIGHEST


def gcn_head_kernel(x_ref, pool_ref, info_ref, w1c_ref, w2c_ref, bc_ref, out_ref):
    # F.relu(uposEmbedding(upossId))  (embedding rows gathered in the wrapper: [T, 4] f32)
    info = jnp.maximum(info_ref[...], 0.0)

    # mean over mapXlmr2Stanza: row-normalized pooling matrix (empty maps -> zero rows).
    # Tiny K, keep it exact.
    appended = jnp.dot(pool_ref[...], info,
                       preferred_element_type=jnp.float32, precision=_HI)   # [TM, 4] f32

    # classifier(F.relu(concat([xlmr, appended], 1))) with the weight split W1|W2 and
    # padded to 128 lanes.  W2c also carries an identity block so `appended` (>= 0, so
    # relu is the identity) lands in lanes LABEL_NUM..LABEL_NUM+POS_DIM-1 of the slab.
    x_relu = jnp.maximum(x_ref[...], 0)                                      # bf16 [TM, 768]
    slab = (jnp.dot(x_relu, w1c_ref[...], preferred_element_type=jnp.float32)
            + jnp.dot(appended, w2c_ref[...],
                      preferred_element_type=jnp.float32, precision=_HI)
            + bc_ref[...])                                                   # [TM, 128] f32

    # F.log_softmax over the LABEL_NUM real logit lanes only.
    lane = jax.lax.broadcasted_iota(jnp.int32, slab.shape, 1)
    is_logit = lane < LABEL_NUM
    masked = jnp.where(is_logit, slab, -jnp.inf)
    m = jnp.max(masked, axis=-1, keepdims=True)
    lse = jnp.log(jnp.sum(jnp.exp(masked - m), axis=-1, keepdims=True)) + m
    out_ref[...] = jnp.where(is_logit, slab - lse, slab)


def _rep_spec(shape):
    nd = len(shape)
    return pl.BlockSpec(shape, lambda i, _nd=nd: (0,) * _nd)


@functools.partial(jax.jit, static_argnames=("tm",))
def gcn_model_head(x_tokens, pool_mat, upos_ids, upos_table, w, b, *, tm=1024):
    """Returns (tokenLogSoftmax [N,5] f32, appended stanza features [N,4] f32)."""
    n = x_tokens.shape[0]
    t = pool_mat.shape[1]

    # uposEmbedding lookup (gather instead of one-hot @ table); relu happens in-kernel.
    info = upos_table[upos_ids]                                              # [T, 4] f32

    # Padded classifier parameters (lane-dense output slab).
    w1 = w[:D_HIDDEN]
    w2 = w[D_HIDDEN:]
    w1c = (jnp.zeros((D_HIDDEN, SLAB), jnp.float32)
           .at[:, :LABEL_NUM].set(w1)
           .astype(jnp.bfloat16))
    w2c = (jnp.zeros((POS_DIM, SLAB), jnp.float32)
           .at[:, :LABEL_NUM].set(w2)
           .at[:, LABEL_NUM:LABEL_NUM + POS_DIM].set(jnp.eye(POS_DIM, dtype=jnp.float32)))
    bc = jnp.zeros((1, SLAB), jnp.float32).at[:, :LABEL_NUM].set(b.reshape(1, LABEL_NUM))

    # Tile the token axis; pad N up to a sublane/tile multiple (padded rows are zeros and
    # get sliced off below).
    n8 = max(8, -(-n // 8) * 8)
    tm_eff = min(tm, n8)
    n_pad = -(-n // tm_eff) * tm_eff
    x_bf = x_tokens.astype(jnp.bfloat16)
    if n_pad != n:
        x_bf = jnp.pad(x_bf, ((0, n_pad - n), (0, 0)))
        pool_mat = jnp.pad(pool_mat, ((0, n_pad - n), (0, 0)))
    grid = (n_pad // tm_eff,)

    cost = pl.CostEstimate(
        flops=2 * n_pad * (D_HIDDEN * SLAB + t * POS_DIM + POS_DIM * SLAB),
        transcendentals=n_pad * (SLAB + 1),
        bytes_accessed=int(x_bf.size * 2 + pool_mat.size * 4 + n_pad * SLAB * 4
                           + w1c.size * 2 + w2c.size * 4 + bc.size * 4 + info.size * 4),
    )

    slab = pl.pallas_call(
        gcn_head_kernel,
        grid=grid,
        in_specs=[
            pl.BlockSpec((tm_eff, D_HIDDEN), lambda i: (i, 0)),   # xlmr tokens (bf16)
            pl.BlockSpec((tm_eff, t), lambda i: (i, 0)),          # pooling matrix rows
            _rep_spec(info.shape),                                # upos embeddings [T,4]
            _rep_spec(w1c.shape),                                 # W1 padded (bf16)
            _rep_spec(w2c.shape),                                 # W2 padded + identity
            _rep_spec(bc.shape),                                  # bias padded
        ],
        out_specs=pl.BlockSpec((tm_eff, SLAB), lambda i: (i, 0)),
        out_shape=jax.ShapeDtypeStruct((n_pad, SLAB), jnp.float32),
        compiler_params=pltpu.CompilerParams(
            dimension_semantics=("parallel",),
            vmem_limit_bytes=32 * 1024 * 1024,
        ),
        cost_estimate=cost,
    )(x_bf, pool_mat, info, w1c, w2c, bc)

    logp = slab[:n, :LABEL_NUM]
    appended = slab[:n, LABEL_NUM:LABEL_NUM + POS_DIM]
    return logp, appended


# ---------------- plain-JAX references (f32, and bf16-matched) ----------------

def reference_f32(x_tokens, pool_mat, upos_ids, upos_table, w, b):
    info = jax.nn.relu(upos_table[upos_ids])
    appended = jnp.dot(pool_mat, info, precision=_HI)
    feats = jnp.concatenate([x_tokens, appended], axis=1)
    logits = jnp.dot(jax.nn.relu(feats), w, precision=_HI) + b
    return jax.nn.log_softmax(logits, axis=1), feats


def reference_bf16(x_tokens, pool_mat, upos_ids, upos_table, w, b):
    info = jax.nn.relu(upos_table[upos_ids])
    appended = jnp.dot(pool_mat, info, precision=_HI)
    x_bf = jnp.maximum(x_tokens.astype(jnp.bfloat16), 0).astype(jnp.float32)
    w1_bf = w[:D_HIDDEN].astype(jnp.bfloat16).astype(jnp.float32)
    logits = (jnp.dot(x_bf, w1_bf, precision=_HI)
              + jnp.dot(appended, w[D_HIDDEN:], precision=_HI) + b)
    return jax.nn.log_softmax(logits, axis=1)


if __name__ == "__main__":
    key = jax.random.PRNGKey(0)
    k_h, k_tab, k_w, k_b = jax.random.split(key, 4)

    # ---- synthetic inputs (stand-in for backbone output + stanza alignment) ----
    B, S = 2, 16
    batch_lengths = [8, 8]                       # tokens per sentence (excl. special tokens)
    last_hidden_state = jax.random.normal(k_h, (B, S, D_HIDDEN), dtype=jnp.float32)

    # gather last_hidden_state[i][1:1+length] and concat across the batch  -> [N, 768]
    x_tokens = jnp.concatenate(
        [last_hidden_state[i, 1:1 + L] for i, L in enumerate(batch_lengths)], axis=0)
    N = x_tokens.shape[0]

    # per-sentence xlmr -> stanza alignment (mapXlmr2Stanza); one empty map to exercise zeros
    map_xlmr2stanza = [
        [[0], [0], [1], [1], [2], [2], [3], []],
        [[0], [0, 1], [1], [2], [2], [3], [3], [3]],
    ]
    t_per_sentence = [4, 4]
    T = sum(t_per_sentence)
    upos_ids = jnp.array([3, 7, 0, 12, 5, 16, 1, 9], dtype=jnp.int32)   # [T]

    # block-diagonal row-normalized mean-pooling matrix  [N, T]
    pool = [[0.0] * T for _ in range(N)]
    row_off, col_off = 0, 0
    for i, maps in enumerate(map_xlmr2stanza):
        for r, m in enumerate(maps):
            for c in m:
                pool[row_off + r][col_off + c] = 1.0 / len(m)
        row_off += batch_lengths[i]
        col_off += t_per_sentence[i]
    pool_mat = jnp.array(pool, dtype=jnp.float32)

    # ---- deterministic parameters (shapes from __init__) ----
    upos_table = 0.1 * jax.random.normal(k_tab, (N_UPOS, POS_DIM), dtype=jnp.float32)
    w_full = 0.03 * jax.random.normal(k_w, (D_HIDDEN + POS_DIM, LABEL_NUM), dtype=jnp.float32)
    b = 0.01 * jax.random.normal(k_b, (LABEL_NUM,), dtype=jnp.float32)

    # ---- run kernel ----
    logp, appended = gcn_model_head(x_tokens, pool_mat, upos_ids, upos_table, w_full, b)
    logp = jax.block_until_ready(logp)
    appended = jax.block_until_ready(appended)
    token_embeddings = jnp.concatenate([x_tokens, appended], axis=1)     # [N, 772]

    # ---- correctness checks ----
    logp_ref, feats_ref = reference_f32(x_tokens, pool_mat, upos_ids, upos_table, w_full, b)
    logp_ref_bf = reference_bf16(x_tokens, pool_mat, upos_ids, upos_table, w_full, b)

    assert logp.shape == (N, LABEL_NUM)
    assert token_embeddings.shape == (N, D_HIDDEN + POS_DIM)
    # semantics check vs pure-f32 module math (loose: classifier dot runs in bf16 on MXU)
    assert jnp.allclose(logp, logp_ref, atol=3e-2, rtol=3e-2)
    # tight check vs bf16-matched reference (catches real bugs, not just rounding)
    assert jnp.allclose(logp, logp_ref_bf, atol=1e-3, rtol=1e-3)
    # appended features are computed in f32 -> token_embeddings matches closely
    assert jnp.allclose(token_embeddings, feats_ref, atol=1e-4, rtol=1e-4)

    print("KERNEL_OK")
</pallas_src>

<mosaic_0001>
module attributes {stable_mosaic.version = 11 : i64} {
  func.func @gcn_head_kernel(%arg0: i32, %arg1: memref<16x768xbf16, #tpu.memory_space<vmem>>, %arg2: memref<16x8xf32, #tpu.memory_space<vmem>>, %arg3: memref<8x4xf32, #tpu.memory_space<vmem>>, %arg4: memref<768x128xbf16, #tpu.memory_space<vmem>>, %arg5: memref<4x128xf32, #tpu.memory_space<vmem>>, %arg6: memref<1x128xf32, #tpu.memory_space<vmem>>, %arg7: memref<16x128xf32, #tpu.memory_space<vmem>>) attributes {dimension_semantics = [#tpu.dimension_semantics<parallel>], iteration_bounds = array<i64: 1>, scalar_prefetch = 0 : i64, scratch_operands = 0 : i64, tpu.core_type = #tpu.core_type<tc>, window_params = [{transform_indices = @transform_0, window_bounds = array<i64: 16, 768>}, {transform_indices = @transform_1, window_bounds = array<i64: 16, 8>}, {pipeline_mode = #tpu.pipeline_mode<synchronous>, transform_indices = @transform_2, window_bounds = array<i64: 8, 4>}, {pipeline_mode = #tpu.pipeline_mode<synchronous>, transform_indices = @transform_3, window_bounds = array<i64: 768, 128>}, {pipeline_mode = #tpu.pipeline_mode<synchronous>, transform_indices = @transform_4, window_bounds = array<i64: 4, 128>}, {pipeline_mode = #tpu.pipeline_mode<synchronous>, transform_indices = @transform_5, window_bounds = array<i64: 1, 128>}, {transform_indices = @transform_6, window_bounds = array<i64: 16, 128>}]} {
    %c0 = arith.constant 0 : index
    %c0_0 = arith.constant 0 : index
    %0 = vector.load %arg3[%c0, %c0_0] : memref<8x4xf32, #tpu.memory_space<vmem>>, vector<8x4xf32>
    %cst = arith.constant 0.000000e+00 : f32
    %1 = vector.broadcast %cst : f32 to vector<8x4xf32>
    %2 = arith.maximumf %0, %1 : vector<8x4xf32>
    %c0_1 = arith.constant 0 : index
    %c0_2 = arith.constant 0 : index
    %3 = vector.load %arg2[%c0_1, %c0_2] : memref<16x8xf32, #tpu.memory_space<vmem>>, vector<16x8xf32>
    %cst_3 = arith.constant dense<0.000000e+00> : vector<16x4xf32>
    %4 = tpu.matmul %3, %2, %cst_3 {dimension_numbers = #tpu.dot_dimension_numbers<[1], [0], [0], [1], [0, 0, 1, 1], [], []>, precision = #tpu.contract_precision<fp32>} : vector<16x8xf32>, vector<8x4xf32>, vector<16x4xf32> -> vector<16x4xf32>
    %c0_4 = arith.constant 0 : index
    %c0_5 = arith.constant 0 : index
    %5 = vector.load %arg1[%c0_4, %c0_5] : memref<16x768xbf16, #tpu.memory_space<vmem>>, vector<16x768xbf16>
    %cst_6 = arith.constant 0.000000e+00 : bf16
    %6 = vector.broadcast %cst_6 : bf16 to vector<16x768xbf16>
    %7 = arith.maximumf %5, %6 : vector<16x768xbf16>
    %c0_7 = arith.constant 0 : index
    %c0_8 = arith.constant 0 : index
    %8 = vector.load %arg4[%c0_7, %c0_8] : memref<768x128xbf16, #tpu.memory_space<vmem>>, vector<768x128xbf16>
    %cst_9 = arith.constant dense<0.000000e+00> : vector<16x128xf32>
    %9 = tpu.matmul %7, %8, %cst_9 {dimension_numbers = #tpu.dot_dimension_numbers<[1], [0], [0], [1], [0, 0, 1, 1], [], []>} : vector<16x768xbf16>, vector<768x128xbf16>, vector<16x128xf32> -> vector<16x128xf32>
    %c0_10 = arith.constant 0 : index
    %c0_11 = arith.constant 0 : index
    %10 = vector.load %arg5[%c0_10, %c0_11] : memref<4x128xf32, #tpu.memory_space<vmem>>, vector<4x128xf32>
    %cst_12 = arith.constant dense<0.000000e+00> : vector<16x128xf32>
    %11 = tpu.matmul %4, %10, %cst_12 {dimension_numbers = #tpu.dot_dimension_numbers<[1], [0], [0], [1], [0, 0, 1, 1], [], []>, precision = #tpu.contract_precision<fp32>} : vector<16x4xf32>, vector<4x128xf32>, vector<16x128xf32> -> vector<16x128xf32>
    %12 = arith.addf %9, %11 : vector<16x128xf32>
    %c0_13 = arith.constant 0 : index
    %c0_14 = arith.constant 0 : index
    %13 = vector.load %arg6[%c0_13, %c0_14] : memref<1x128xf32, #tpu.memory_space<vmem>>, vector<1x128xf32>
    %14 = vector.broadcast %13 : vector<1x128xf32> to vector<16x128xf32>
    %15 = arith.addf %12, %14 : vector<16x128xf32>
    %16 = tpu.iota {dimensions = array<i32: 1>} : vector<16x128xi32>
    %c5_i32 = arith.constant 5 : i32
    %17 = vector.broadcast %c5_i32 : i32 to vector<16x128xi32>
    %18 = arith.cmpi slt, %16, %17 : vector<16x128xi32>
    %cst_15 = arith.constant 0xFF800000 : f32
    %19 = vector.broadcast %cst_15 : f32 to vector<16x128xf32>
    %20 = arith.select %18, %15, %19 : vector<16x128xi1>, vector<16x128xf32>
    %cst_16 = arith.constant dense<0xFF800000> : vector<16xf32>
    %21 = vector.multi_reduction <maximumf>, %20, %cst_16 [1] : vector<16x128xf32> to vector<16xf32>
    %22 = vector.shape_cast %21 : vector<16xf32> to vector<16x1xf32>
    %23 = vector.broadcast %22 : vector<16x1xf32> to vector<16x128xf32>
    %24 = arith.subf %20, %23 : vector<16x128xf32>
    %25 = math.exp %24 : vector<16x128xf32>
    %cst_17 = arith.constant dense<0.000000e+00> : vector<16xf32>
    %26 = vector.multi_reduction <add>, %25, %cst_17 [1] : vector<16x128xf32> to vector<16xf32>
    %27 = vector.shape_cast %26 : vector<16xf32> to vector<16x1xf32>
    %28 = math.log %27 : vector<16x1xf32>
    %29 = arith.addf %28, %22 : vector<16x1xf32>
    %30 = vector.broadcast %29 : vector<16x1xf32> to vector<16x128xf32>
    %31 = arith.subf %15, %30 : vector<16x128xf32>
    %32 = arith.select %18, %31, %15 : vector<16x128xi1>, vector<16x128xf32>
    %c0_18 = arith.constant 0 : index
    %c0_19 = arith.constant 0 : index
    %33 = vector.load %arg7[%c0_18, %c0_19] : memref<16x128xf32, #tpu.memory_space<vmem>>, vector<16x128xf32>
    tpu.vector_store %arg7[%c0_18, %c0_19], %32 {strides = array<i32>} : memref<16x128xf32, #tpu.memory_space<vmem>>, vector<16x128xf32>,
    return
  }
  func.func @transform_0(%arg0: i32) -> (i32, i32) {
    %c0_i32 = arith.constant 0 : i32
    %c0_i32_0 = arith.constant 0 : i32
    return %arg0, %c0_i32 : i32, i32
  }
  func.func @transform_1(%arg0: i32) -> (i32, i32) {
    %c0_i32 = arith.constant 0 : i32
    %c0_i32_0 = arith.constant 0 : i32
    return %arg0, %c0_i32 : i32, i32
  }
  func.func @transform_2(%arg0: i32) -> (i32, i32) {
    %c0_i32 = arith.constant 0 : i32
    %c0_i32_0 = arith.constant 0 : i32
    %c0_i32_1 = arith.constant 0 : i32
    return %c0_i32, %c0_i32_0 : i32, i32
  }
  func.func @transform_3(%arg0: i32) -> (i32, i32) {
    %c0_i32 = arith.constant 0 : i32
    %c0_i32_0 = arith.constant 0 : i32
    %c0_i32_1 = arith.constant 0 : i32
    return %c0_i32, %c0_i32_0 : i32, i32
  }
  func.func @transform_4(%arg0: i32) -> (i32, i32) {
    %c0_i32 = arith.constant 0 : i32
    %c0_i32_0 = arith.constant 0 : i32
    %c0_i32_1 = arith.constant 0 : i32
    return %c0_i32, %c0_i32_0 : i32, i32
  }
  func.func @transform_5(%arg0: i32) -> (i32, i32) {
    %c0_i32 = arith.constant 0 : i32
    %c0_i32_0 = arith.constant 0 : i32
    %c0_i32_1 = arith.constant 0 : i32
    return %c0_i32, %c0_i32_0 : i32, i32
  }
  func.func @transform_6(%arg0: i32) -> (i32, i32) {
    %c0_i32 = arith.constant 0 : i32
    %c0_i32_0 = arith.constant 0 : i32
    return %arg0, %c0_i32 : i32, i32
  }
}

</mosaic_0001>

<bundles_post_ra>
// kernel: gcn_model_head.1
= control target key start
LH: loop header
LB: loop body
LE: loop exit
PB: predicated region body
PF: predicated region fallthrough
CT: control target
= control target key end

     0   :  { %vm28_vm0 = vcmask 64512   ;;  %vm640_vm1 = vcmask 1043456   ;;  %vm633_vm2 = vcmask 31744   ;;  %v1892_v62 = vmov 0   ;;  %s2146_s2 = inlined_call_operand.vmem [shape: f32[8,4], index: 2, kind: input, shape index: {}]   ;;  %s2147_s1 = inlined_call_operand.vmem [shape: f32[16,8], index: 1, kind: input, shape index: {}]   ;;  %s2148_s4 = inlined_call_operand.vmem [shape: f32[4,128], index: 4, kind: input, shape index: {}]   ;;  %s2149_s3 = inlined_call_operand.vmem [shape: bf16[768,128], index: 3, kind: input, shape index: {}]   ;;  %s2150_s0 = inlined_call_operand.vmem [shape: bf16[16,768], index: 0, kind: input, shape index: {}]   ;;  %s2151_s5 = inlined_call_operand.vmem [shape: f32[1,128], index: 5, kind: input, shape index: {}]   ;;  %s2152_s6 = inlined_call_operand.vmem [shape: f32[16,128], index: 6, kind: output, shape index: {}]  }
   0x1   :  { %v24_v0 = vld [vmem:[%s2146_s2] sm:$0xff]  ;;  %v27_v2 = vld [vmem:[%s2147_s1 + $0x8] sm:$0xff]  ;;  %v527_v58 = vld [vmem:[%s2150_s0 + $0x18] sm:$0xff] }
   0x2   :  { %v26_v1 = vld [vmem:[%s2147_s1] sm:$0xff]  ;;  %v25_v3 = vmax.f32 %v24_v0, 0.0  ;;  %v33_v5 = vsel %vm28_vm0, %v27_v2, 0  ;;  %v1836_v59 = vld [vmem:[%s2149_s3 + $0x78] sm:$0xff]   ;;  %v1958_v0 = vmax.bf16 %v1892_v62, %v527_v58  ;;  %v1878_v58 = vld [vmem:[%s2149_s3 + $0x150] sm:$0xff]  }
   0x3   :  { %v30_v4 = vsel %vm28_vm0, %v26_v1, 0  ;;  %v111_v7 = vand.u32 4294901760, %v33_v5  ;;  %v632_v21 = vld [vmem:[%s2148_s4] sm:$0xf]  ;;  %v1837_v1 = vld [vmem:[%s2149_s3 + $0x38] sm:$0xff]  }
   0x4   :  { %v101_v6 = vand.u32 4294901760, %v30_v4  ;;  %v66_v8 = vand.u32 4294901760, %v25_v3  ;;  %v642_v22 = vsel %vm640_vm1, %v632_v21, 0  ;;  %v524_v57 = vld [vmem:[%s2150_s0] sm:$0xff]  ;;  %v1847_v21 = vld [vmem:[%s2149_s3 + $0x18] sm:$0xff]  }
   0x5   :  { %v112_v10 = vsub.f32 %v33_v5, %v111_v7  ;;  %v1940_v23 = vand.u32 4294901760, %v642_v22  ;;  %v1955_v63 = vmax.bf16 %v1892_v62, %v524_v57  ;;  %v1877_v57 = vld [vmem:[%s2149_s3 + $0x118] sm:$0xff]  }
   0x6   :  { %v102_v9 = vsub.f32 %v30_v4, %v101_v6  ;;  %1775 = vmatprep.subr.mxu1 %v66_v8  ;;  %v153_v11 = vsub.f32 %v25_v3, %v66_v8  ;;  %v1838_v3 = vld [vmem:[%s2149_s3 + $0x70] sm:$0xff]  }
   0x7   :  { %1776 = vmatpush3.msra.mxu1 %v66_v8  ;;  %v113_v13 = vand.u32 4294901760, %v112_v10  ;;  %v762_v24 = vsub.f32 %v642_v22, %v1940_v23  ;;  %v1850_v22 = vld [vmem:[%s2149_s3 + $0x50] sm:$0xff]  }
   0x8   :  { %v103_v12 = vand.u32 4294901760, %v102_v9  ;;  %v154_v14 = vand.u32 4294901760, %v153_v11 }
   0x9   :  { %v114_v16 = vsub.f32 %v112_v10, %v113_v13  ;;  %1815 = vmatprep.subr.mxu0 %v762_v24  ;;  %v763_v25 = vand.u32 4294901760, %v762_v24 }
   0xa   :  { %v104_v15 = vsub.f32 %v102_v9, %v103_v12  ;;  %v155_v17 = vsub.f32 %v153_v11, %v154_v14  ;;  %1816 = vmatpush3.msra.mxu0 %v762_v24 }
   0xb   :  { %v115_v19 = vand.u32 4294901760, %v114_v16  ;;  %1825 = vmatprep.subr.mxu0 %v763_v25  ;;  %v764_v26 = vsub.f32 %v762_v24, %v763_v25  ;;  %v1843_v16 = vld [vmem:[%s2149_s3 + $0x20] sm:$0xff]   ;;  %v1852_v24 = vld [vmem:[%s2149_s3 + $0xe8] sm:$0xff]  }
   0xc   :  { %v105_v18 = vand.u32 4294901760, %v104_v15  ;;  %v156_v20 = vand.u32 4294901760, %v155_v17  ;;  %v1844_v15 = vld [vmem:[%s2149_s3 + $0xf8] sm:$0xff]  }
   0xd   :  { %v765_v27 = vand.u32 4294901760, %v764_v26  ;;  %v1846_v17 = vld [vmem:[%s2149_s3 + $0x58] sm:$0xff]   ;;  %v1854_v26 = vld [vmem:[%s2149_s3 + $0x48] sm:$0xff]  }
   0xe   :  { %1777 = vmatprep.mubr.f32.mxu1 %v105_v18  ;;  %1780 = vmatprep.subr.mxu1 %v156_v20  ;;  %v1845_v18 = vld [vmem:[%s2149_s3 + $0xb8] sm:$0xff]  }
   0xf   :  { %1778 = vmatmul.mubr.f32.vlgmr.msra.gmra.mxu1 %v115_v19 }
  0x10   :  { %1781 = vmatpush3.msra.mxu1 %v156_v20  ;;  %1782 = vmatprep.mubr.f32.mxu1 %v101_v6  ;;  %v1848_v20 = vld [vmem:[%s2149_s3 + $0xf0] sm:$0xff]  }
  0x11   :  { %1785 = vmatprep.subr.mxu1 %v153_v11 }
  0x13   :  { %1783 = vmatmul.mubr.f32.vlgmr.msra.gmra.mxu1 %v111_v7 }
  0x14   :  { %1786 = vmatpush3.msra.mxu1 %v153_v11  ;;  %1787 = vmatprep.mubr.f32.mxu1 %v102_v9  ;;  %v525_v9 = vld [vmem:[%s2150_s0 + $0x8] sm:$0xff] }
  0x15   :  { %1790 = vmatprep.subr.mxu1 %v66_v8  ;;  %v1841_v11 = vld [vmem:[%s2149_s3 + $0x28] sm:$0xff]  }
  0x17   :  { %1788 = vmatmul.mubr.f32.vlgmr.msra.gmra.mxu1 %v112_v10  ;;  %v528_v10 = vld [vmem:[%s2150_s0 + $0x20] sm:$0xff] }
  0x18   :  { %1791 = vmatpush3.msra.mxu1 %v66_v8  ;;  %1792 = vmatprep.mubr.f32.mxu1 %v103_v12  ;;  %v1842_v12 = vld [vmem:[%s2149_s3 + $0x60] sm:$0xff]  }
  0x19   :  { %1795 = vmatprep.subr.mxu1 %v154_v14 }
  0x1b   :  { %1793 = vmatmul.mubr.f32.vlgmr.msra.gmra.mxu1 %v113_v13  ;;  %v1989_v13 = vmax.bf16 %v1892_v62, %v525_v9 }
  0x1c   :  { %1796 = vmatpush3.msra.mxu1 %v154_v14  ;;  %1797 = vmatprep.mubr.f32.mxu1 %v101_v6  ;;  %v1992_v14 = vmax.bf16 %v1892_v62, %v528_v10 }
  0x1d   :  { %1800 = vmatprep.subr.mxu1 %v66_v8 }
  0x1e   :  { %v1621_v19 = vcombine.high %v1989_v13, %v1992_v14 }
  0x1f   :  { %1798 = vmatmul.mubr.f32.vlgmr.msra.gmra.mxu1 %v111_v7 }
  0x20   :  { %1801 = vmatpush3.msra.mxu1 %v66_v8  ;;  %1802 = vmatprep.mubr.f32.mxu1 %v101_v6  ;;  %v1619_v6 = vcombine.high %v1955_v63, %v1958_v0  ;;  %v1840_v8 = vld [vmem:[%s2149_s3 + $0x68] sm:$0xff]  }
  0x21   :  { %1805 = vmatprep.subr.mxu1 %v1940_v23 }
  0x23   :  { %1803 = vmatmul.mubr.f32.vlgmr.msra.gmra.mxu1 %v111_v7  ;;  %v1839_v7 = vld [vmem:[%s2149_s3 + $0x30] sm:$0xff]  }
  0x24   :  { %1806 = vmatpush3.msra.mxu1 %v1940_v23 }
  0x25   :  { %1810 = vmatprep.subr.mxu1 %v765_v27 }
  0xcf   :  { %v1779_v28 = vpop.f32.mrf.mxu1 }
  0xd1   :  { %v107_v29 = vpop.f32.mrf.mxu1 }
  0xd3   :  { %v1784_v30 = vpop.f32.mrf.mxu1 }
  0xd4   :  { %v200_v35 = vadd.f32 %v1784_v30, %v1779_v28  ;;  %v1856_v28 = vld [vmem:[%s2149_s3 + $0xe0] sm:$0xff]  }
  0xd5   :  { %v193_v31 = vpop.f32.mrf.mxu1  ;;  %v1858_v30 = vld [vmem:[%s2149_s3 + $0x40] sm:$0xff]  }
  0xd6   :  { %v194_v37 = vadd.f32 %v193_v31, %v107_v29  ;;  %v1855_v29 = vld [vmem:[%s2149_s3 + $0x8] sm:$0xff]   ;;  %v526_v31 = vld [vmem:[%s2150_s0 + $0x10] sm:$0xff] }
  0xd7   :  { %v1789_v32 = vpop.f32.mrf.mxu1 }
  0xd8   :  { %v281_v38 = vadd.f32 %v1789_v32, %v200_v35  ;;  %v529_v32 = vld [vmem:[%s2150_s0 + $0x28] sm:$0xff]  ;;  %v1859_v35 = vld [vmem:[%s2149_s3] sm:$0xff]  }
  0xd9   :  { %v273_v33 = vpop.f32.mrf.mxu1 }
  0xda   :  { %v274_v40 = vadd.f32 %v273_v33, %v194_v37  ;;  %v1857_v33 = vld [vmem:[%s2149_s3 + $0xa0] sm:$0xff]   ;;  %v535_v37 = vmax.bf16 %v1892_v62, %v529_v32 }
  0xdb   :  { %v1794_v34 = vpop.f32.mrf.mxu1 }
  0xdc   :  { %v363_v41 = vadd.f32 %v1794_v34, %v281_v38  ;;  %v1860_v34 = vld [vmem:[%s2149_s3 + $0xd8] sm:$0xff]  }
  0xdd   :  { %v354_v36 = vpop.f32.mrf.mxu1  ;;  %v1862_v38 = vld [vmem:[%s2149_s3 + $0x178] sm:$0xff]  }
  0xde   :  { %v355_v43 = vadd.f32 %v354_v36, %v274_v40  ;;  %v532_v36 = vmax.bf16 %v1892_v62, %v526_v31  ;;  %v1618_v40 = vcombine.low %v1955_v63, %v1958_v0  ;;  %v1882_v62 = vld [vmem:[%s2149_s3 + $0x140] sm:$0xff]  }
  0xdf   :  { %v1799_v39 = vpop.f32.mrf.mxu1  ;;  %v1883_v63 = vld [vmem:[%s2149_s3 + $0x100] sm:$0xff]  }
  0xe0   :  { %v443_v44 = vadd.f32 %v1799_v39, %v363_v41  ;;  %v1861_v39 = vld [vmem:[%s2149_s3 + $0x98] sm:$0xff]   ;;  %v1864_v41 = vld [vmem:[%s2149_s3 + $0xd0] sm:$0xff]   ;;  %v1622_v0 = vcombine.low %v532_v36, %v535_v37 }
  0xe1   :  { %v436_v42 = vpop.f32.mrf.mxu1 }
  0xe2   :  { %v437_v46 = vadd.f32 %v436_v42, %v355_v43  ;;  %v1863_v42 = vld [vmem:[%s2149_s3 + $0x138] sm:$0xff]   ;;  %v1623_v43 = vcombine.high %v532_v36, %v535_v37 }
  0xe3   :  { %v1804_v45 = vpop.f32.mrf.mxu1 }
  0xe4   :  { %v521_v47 = vadd.f32 %v1804_v45, %v443_v44  ;;  %v1866_v44 = vld [vmem:[%s2149_s3 + $0x170] sm:$0xff]  }
  0xe5   :  { %v514_v48 = vpop.f32.mrf.mxu1  ;;  %v1865_v45 = vld [vmem:[%s2149_s3 + $0x90] sm:$0xff]  }
  0xe6   :  { %v638_v49 = vsel %vm633_vm2, %v521_v47, 0  ;;  %v515_v50 = vadd.f32 %v514_v48, %v437_v46  ;;  %v1868_v46 = vld [vmem:[%s2149_s3 + $0xc8] sm:$0xff]   ;;  %v1867_v47 = vld [vmem:[%s2149_s3 + $0x130] sm:$0xff]  }
  0xe7   :  { %v720_v51 = vand.u32 4294901760, %v638_v49  ;;  %v1870_v48 = vld [vmem:[%s2149_s3 + $0x168] sm:$0xff]  }
  0xe8   :  { %v635_v52 = vsel %vm633_vm2, %v515_v50, 0  ;;  %v1872_v50 = vld [vmem:[%s2149_s3 + $0xc0] sm:$0xff]  }
  0xe9   :  { %v721_v53 = vsub.f32 %v638_v49, %v720_v51  ;;  %v710_v54 = vand.u32 4294901760, %v635_v52  ;;  %v1869_v49 = vld [vmem:[%s2149_s3 + $0x88] sm:$0xff]  }
  0xeb   :  { %v722_v55 = vand.u32 4294901760, %v721_v53  ;;  %v711_v56 = vsub.f32 %v635_v52, %v710_v54  ;;  %v1874_v52 = vld [vmem:[%s2149_s3 + $0x160] sm:$0xff]  }
  0xed   :  { %1817 = vmatprep.mubr.f32.mxu0 %v711_v56  ;;  %v712_v60 = vand.u32 4294901760, %v711_v56  ;;  %v723_v61 = vsub.f32 %v721_v53, %v722_v55 }
  0xee   :  { %1818 = vmatmul.mubr.f32.vlgmr.msra.gmra.mxu0 %v721_v53  ;;  %v1873_v53 = vld [vmem:[%s2149_s3 + $0x80] sm:$0xff]  }
  0xef   :  { %1826 = vmatpush3.msra.mxu0 %v763_v25  ;;  %1827 = vmatprep.mubr.f32.mxu0 %v710_v54  ;;  %v713_v2 = vsub.f32 %v711_v56, %v712_v60  ;;  %v724_v5 = vand.u32 4294901760, %v723_v61  ;;  %v1851_v25 = vld [vmem:[%s2149_s3 + $0x10] sm:$0xff]   ;;  %v1876_v56 = vld [vmem:[%s2149_s3 + $0x158] sm:$0xff]   ;;  %v1881_v61 = vld [vmem:[%s2149_s3 + $0x108] sm:$0xff]  }
  0xf0   :  { %1709 = vmatprep.subr.bf16.mxu0 %v1836_v59  ;;  %v1879_v59 = vld [vmem:[%s2149_s3 + $0x110] sm:$0xff]  }
  0xf1   :  { %v714_v4 = vand.u32 4294901760, %v713_v2 }
  0xf2   :  { %1828 = vmatmul.mubr.f32.vlgmr.msra.gmra.mxu0 %v720_v51 }
  0xf3   :  { %1710 = vmatpush3.bf16.msra.mxu0 %v1837_v1  ;;  %1807 = vmatprep.mubr.f32.mxu1 %v714_v4 }
  0xf4   :  { %1808 = vmatmul.mubr.f32.vlgmr.msra.gmra.mxu1 %v724_v5  ;;  %1711 = vmatprep.subr.bf16.mxu0 %v1838_v3 }
  0xf5   :  { %1812 = vmatprep.mubr.f32.mxu1 %v710_v54  ;;  %1811 = vmatpush3.msra.mxu1 %v765_v27  ;;  %v1853_v27 = vld [vmem:[%s2149_s3 + $0xa8] sm:$0xff]  }
  0xf6   :  { %1820 = vmatprep.subr.mxu1 %v1940_v23  ;;  %1483 = vmatprep.mubr.bf16.mxu0 %v1619_v6 }
  0xf7   :  { %1712 = vmatpush3.bf16.msra.mxu0 %v1839_v7 }
  0xf8   :  { %1813 = vmatmul.mubr.f32.vlgmr.msra.gmra.mxu1 %v720_v51  ;;  %1713 = vmatprep.subr.bf16.mxu0 %v1840_v8 }
  0xf9   :  { %1822 = vmatprep.mubr.f32.mxu1 %v712_v60  ;;  %1821 = vmatpush3.msra.mxu1 %v1940_v23  ;;  %v1880_v60 = vld [vmem:[%s2149_s3 + $0x148] sm:$0xff]  }
  0xfa   :  { %1830 = vmatprep.subr.mxu1 %v1940_v23 }
  0xfb   :  { %1714 = vmatpush3.bf16.msra.mxu0 %v1841_v11 }
  0xfc   :  { %1823 = vmatmul.mubr.f32.vlgmr.msra.gmra.mxu1 %v722_v55  ;;  %1715 = vmatprep.subr.bf16.mxu0 %v1842_v12  ;;  %v1620_v55 = vcombine.low %v1989_v13, %v1992_v14 }
  0xfd   :  { %1832 = vmatprep.mubr.f32.mxu1 %v710_v54  ;;  %1831 = vmatpush3.msra.mxu1 %v1940_v23  ;;  %v1849_v23 = vld [vmem:[%s2149_s3 + $0xb0] sm:$0xff]   ;;  %v1875_v54 = vld [vmem:[%s2149_s3 + $0x120] sm:$0xff]  }
  0xfe   :  { %1731 = vmatprep.subr.bf16.mxu1 %v1844_v15 }
  0xff   :  { %1716 = vmatpush3.bf16.msra.mxu0 %v1843_v16 }
 0x100   :  { %1833 = vmatmul.mubr.f32.vlgmr.msra.gmra.mxu1 %v720_v51  ;;  %1717 = vmatprep.subr.bf16.mxu0 %v1846_v17  ;;  %v1871_v51 = vld [vmem:[%s2149_s3 + $0x128] sm:$0xff]  }
 0x101   :  { %1732 = vmatpush3.bf16.msra.mxu1 %v1845_v18  ;;  %1524 = vmatprep.mubr.bf16.mxu1 %v1621_v19 }
 0x102   :  { %1733 = vmatprep.subr.bf16.mxu1 %v1848_v20 }
 0x103   :  { %1718 = vmatpush3.bf16.msra.mxu0 %v1847_v21 }
 0x104   :  { %1719 = vmatprep.subr.bf16.mxu0 %v1850_v22 }
 0x105   :  { %1734 = vmatpush3.bf16.msra.mxu1 %v1849_v23 }
 0x106   :  { %1735 = vmatprep.subr.bf16.mxu1 %v1852_v24 }
 0x107   :  { %1720 = vmatpush3.bf16.msra.mxu0 %v1851_v25 }
 0x108   :  { %1721 = vmatprep.subr.bf16.mxu0 %v1854_v26 }
 0x109   :  { %1736 = vmatpush3.bf16.msra.mxu1 %v1853_v27 }
 0x10a   :  { %1737 = vmatprep.subr.bf16.mxu1 %v1856_v28  ;;  %v1583_v28 = vlaneseq }
 0x10b   :  { %1722 = vmatpush3.bf16.msra.mxu0 %v1855_v29 }
 0x10c   :  { %1723 = vmatprep.subr.bf16.mxu0 %v1858_v30  ;;  %v1584_v37 = vand.u32 127, %v1583_v28 }
 0x10d   :  { %1738 = vmatpush3.bf16.msra.mxu1 %v1857_v33 }
 0x10e   :  { %1739 = vmatprep.subr.bf16.mxu1 %v1860_v34  ;;  %vm1585_vm3 = vcmp.lt.s32.totalorder %v1584_v37, 5 }
 0x10f   :  { %1724 = vmatpush3.bf16.msra.mxu0 %v1859_v35 }
 0x110   :  { %1753 = vmatprep.subr.bf16.mxu0 %v1862_v38 }
 0x111   :  { %1740 = vmatpush3.bf16.msra.mxu1 %v1861_v39 }
 0x112   :  { %1484 = vmatmul.mubr.bf16.vlgmr.msra.gmra.mxu0 %v1618_v40  ;;  %1741 = vmatprep.subr.bf16.mxu1 %v1864_v41 }
 0x113   :  { %1754 = vmatpush3.bf16.msra.mxu0 %v1863_v42  ;;  %1565 = vmatprep.mubr.bf16.mxu0 %v1623_v43  ;;  %v1672_v42 = vld [vmem:[%s2151_s5] ss:$0 sm:$0xff] }
 0x114   :  { %1755 = vmatprep.subr.bf16.mxu0 %v1866_v44 }
 0x115   :  { %1742 = vmatpush3.bf16.msra.mxu1 %v1865_v45 }
 0x116   :  { %1743 = vmatprep.subr.bf16.mxu1 %v1868_v46 }
 0x117   :  { %1756 = vmatpush3.bf16.msra.mxu0 %v1867_v47 }
 0x118   :  { %1757 = vmatprep.subr.bf16.mxu0 %v1870_v48 }
 0x119   :  { %1744 = vmatpush3.bf16.msra.mxu1 %v1869_v49 }
 0x11a   :  { %1745 = vmatprep.subr.bf16.mxu1 %v1872_v50 }
 0x11b   :  { %1758 = vmatpush3.bf16.msra.mxu0 %v1871_v51 }
 0x11c   :  { %1759 = vmatprep.subr.bf16.mxu0 %v1874_v52 }
 0x11d   :  { %1746 = vmatpush3.bf16.msra.mxu1 %v1873_v53 }
 0x11f   :  { %1760 = vmatpush3.bf16.msra.mxu0 %v1875_v54 }
 0x120   :  { %1525 = vmatmul.mubr.bf16.vlgmr.msra.gmra.mxu1 %v1620_v55  ;;  %1761 = vmatprep.subr.bf16.mxu0 %v1876_v56 }
 0x123   :  { %1762 = vmatpush3.bf16.msra.mxu0 %v1877_v57 }
 0x124   :  { %1763 = vmatprep.subr.bf16.mxu0 %v1878_v58 }
 0x127   :  { %1764 = vmatpush3.bf16.msra.mxu0 %v1879_v59 }
 0x128   :  { %1765 = vmatprep.subr.bf16.mxu0 %v1880_v60 }
 0x12b   :  { %1766 = vmatpush3.bf16.msra.mxu0 %v1881_v61 }
 0x12c   :  { %1767 = vmatprep.subr.bf16.mxu0 %v1882_v62 }
 0x12f   :  { %1768 = vmatpush3.bf16.msra.mxu0 %v1883_v63 }
 0x132   :  { %1566 = vmatmul.mubr.bf16.vlgmr.msra.gmra.mxu0 %v1622_v0 }
 0x1ae   :  { %v1819_v5 = vpop.f32.mrf.mxu0 }
 0x1b0   :  { %v882_v7 = vpop.f32.mrf.mxu0 }
 0x1b2   :  { %v1829_v9 = vpop.f32.mrf.mxu0 }
 0x1b4   :  { %v1809_v1 = vpop.f32.mrf.mxu1  ;;  %v1045_v12 = vpop.f32.mrf.mxu0 }
 0x1b6   :  { %v716_v2 = vpop.f32.mrf.mxu1 }
 0x1b8   :  { %v1814_v3 = vpop.f32.mrf.mxu1 }
 0x1b9   :  { %v809_v15 = vadd.f32 %v1814_v3, %v1809_v1 }
 0x1ba   :  { %v802_v4 = vpop.f32.mrf.mxu1 }
 0x1bb   :  { %v803_v11 = vadd.f32 %v802_v4, %v716_v2  ;;  %v890_v19 = vadd.f32 %v1819_v5, %v809_v15 }
 0x1bc   :  { %v1824_v6 = vpop.f32.mrf.mxu1 }
 0x1bd   :  { %v883_v16 = vadd.f32 %v882_v7, %v803_v11  ;;  %v972_v23 = vadd.f32 %v1824_v6, %v890_v19 }
 0x1be   :  { %v963_v8 = vpop.f32.mrf.mxu1 }
 0x1bf   :  { %v964_v20 = vadd.f32 %v963_v8, %v883_v16  ;;  %v1052_v29 = vadd.f32 %v1829_v9, %v972_v23 }
 0x1c0   :  { %v1834_v10 = vpop.f32.mrf.mxu1 }
 0x1c1   :  { %v1046_v24 = vadd.f32 %v1045_v12, %v964_v20  ;;  %v1130_v38 = vadd.f32 %v1834_v10, %v1052_v29 }
 0x1c2   :  { %v1123_v13 = vpop.f32.mrf.mxu1 }
 0x1c3   :  { %v1124_v30 = vadd.f32 %v1123_v13, %v1046_v24 }
 0x1d2   :  { %v1725_v14 = vpop.f32.mrf.mxu0 }
 0x1d4   :  { %v1726_v18 = vpop.f32.mrf.mxu0 }
 0x1d5   :  { %v1727_v26 = vadd.f32 %v1726_v18, %v1725_v14 }
 0x1d6   :  { %v1728_v22 = vpop.f32.mrf.mxu0 }
 0x1d7   :  { %v1486_v34 = vadd.f32 %v1727_v26, %v1124_v30 }
 0x1d8   :  { %v1729_v27 = vpop.f32.mrf.mxu0 }
 0x1d9   :  { %v1730_v35 = vadd.f32 %v1729_v27, %v1728_v22 }
 0x1db   :  { %v1489_v44 = vadd.f32 %v1730_v35, %v1130_v38 }
 0x1e0   :  { %v1747_v17 = vpop.f32.mrf.mxu1 }
 0x1e2   :  { %v1748_v21 = vpop.f32.mrf.mxu1 }
 0x1e3   :  { %v1749_v31 = vadd.f32 %v1748_v21, %v1747_v17 }
 0x1e4   :  { %v1750_v25 = vpop.f32.mrf.mxu1 }
 0x1e5   :  { %v1527_v39 = vadd.f32 %v1749_v31, %v1486_v34 }
 0x1e6   :  { %v1751_v32 = vpop.f32.mrf.mxu1 }
 0x1e7   :  { %v1752_v40 = vadd.f32 %v1751_v32, %v1750_v25 }
 0x1e9   :  { %v1530_v47 = vadd.f32 %v1752_v40, %v1489_v44 }
 0x1f2   :  { %v1769_v33 = vpop.f32.mrf.mxu0 }
 0x1f4   :  { %v1770_v36 = vpop.f32.mrf.mxu0 }
 0x1f5   :  { %v1771_v41 = vadd.f32 %v1770_v36, %v1769_v33 }
 0x1f6   :  { %v1772_v43 = vpop.f32.mrf.mxu0 }
 0x1f7   :  { %v1568_v45 = vadd.f32 %v1771_v41, %v1527_v39 }
 0x1f8   :  { %v1773_v46 = vpop.f32.mrf.mxu0 }
 0x1f9   :  { %v1581_v48 = vadd.f32 %v1672_v42, %v1568_v45  ;;  %v1774_v49 = vadd.f32 %v1773_v46, %v1772_v43 }
 0x1fb   :  { %v1571_v50 = vadd.f32 %v1774_v49, %v1530_v47  ;;  %v1586_v51 = vsel %vm1585_vm3, %v1581_v48, -inf }
 0x1fc   :  { %1588 = vmax.xlane.f32.xlu0 %v1586_v51 }
 0x1fd   :  { %v1582_v52 = vadd.f32 %v1672_v42, %v1571_v50 }
 0x1ff   :  { %v1587_v53 = vsel %vm1585_vm3, %v1582_v52, -inf }
 0x200   :  { %1590 = vmax.xlane.f32.xlu0 %v1587_v53 }
 0x285   :  { %v1589_v54 = vpop.xlane.xlu0 %1588 }
 0x286   :  { %v1592_v55 = vsub.f32 %v1586_v51, %v1589_v54 }
 0x288   :  { %v1594_v56 = vmul.f32 1.442695, %v1592_v55 }
 0x289   :  { %v1591_v57 = vpop.xlane.xlu0 %1590 }
 0x28a   :  { %1884 = vpow2.f32 %v1594_v56  ;;  %v1593_v58 = vsub.f32 %v1587_v53, %v1591_v57 }
 0x28c   :  { %v1596_v59 = vmul.f32 1.442695, %v1593_v58 }
 0x28e   :  { %1886 = vpow2.f32 %v1596_v59 }
 0x297   :  { %v1885_v60 = vpop.eup %1884 }
 0x298   :  { %1598 = vadd.xlane.f32.xlu1 %v1885_v60 }
 0x29b   :  { %v1887_v61 = vpop.eup %1886 }
 0x29c   :  { %1600 = vadd.xlane.f32.xlu1 %v1887_v61 }
 0x321   :  { %v1599_v62 = vpop.xlane.xlu1 %1598 }
 0x322   :  { %1888 = vlog2.f32 %v1599_v62 }
 0x325   :  { %v1601_v63 = vpop.xlane.xlu1 %1600 }
 0x326   :  { %1890 = vlog2.f32 %v1601_v63 }
 0x32f   :  { %v1889_v0 = vpop.eup %1888 }
 0x330   :  { %v1603_v1 = vmul.f32 0.6931472, %v1889_v0 }
 0x332   :  { %v1606_v2 = vadd.f32 %v1603_v1, %v1589_v54 }
 0x333   :  { %v1891_v3 = vpop.eup %1890 }
 0x334   :  { %v1608_v4 = vsub.f32 %v1581_v48, %v1606_v2  ;;  %v1605_v5 = vmul.f32 0.6931472, %v1891_v3 }
 0x336   :  { %v1610_v6 = vsel %vm1585_vm3, %v1608_v4, %v1581_v48  ;;  %v1607_v7 = vadd.f32 %v1605_v5, %v1591_v57 }
 0x337   :  { %1612 = vst [vmem:[%s2152_s6] sm:$0xff] %v1610_v6 }
 0x338   :  { %v1609_v8 = vsub.f32 %v1582_v52, %v1607_v7 }
 0x33a   :  { %v1611_v9 = vsel %vm1585_vm3, %v1609_v8, %v1582_v52 }
 0x33b   :  { %1613 = vst [vmem:[%s2152_s6 + $0x8] sm:$0xff] %v1611_v9 }

</bundles_post_ra>
